<compile_context>
chip_gen: v7x
topology: tpu7x:2x2x1
jax: 0.10.0
libtpu: 0.0.40
codegen_flags: <defaults>
</compile_context>

<pallas_src>
import functools

import jax
import jax.numpy as jnp
from jax.experimental import pallas as pl
from jax.experimental.pallas import tpu as pltpu

# Small synthetic shapes consistent with the module's forward pass.
B, S, F, H, C = 2, 8, 16, 32, 4
NEG_INF = -1e9
EPS = 1e-8


def gct_kernel(x_ref, bp_ref, w_ref, b_ref, out_ref):
    """One grid step = one block of `bb` batch elements."""
    bb, s, _ = bp_ref.shape           # (bb, s, 2s)
    h = w_ref.shape[0]
    c = b_ref.shape[1] - 3 * h

    x = x_ref[...]                    # (bb*s, h) bf16  (features zero-padded to h)
    w = w_ref[...]                    # (h, 6h+c) bf16  single packed weight slab
    bvec = b_ref[...]                 # (1, 3h+c) f32   single packed bias row

    # static lane-offset views into the packed slabs
    we   = w[:, 0:h]                  # embedder
    wqkv = w[:, h:4 * h]              # fused Q|K|V (attn scale folded into Q)
    w1   = w[:, 4 * h:5 * h]          # FFN 1
    w2   = w[:, 5 * h:6 * h]          # FFN 2
    wc   = w[:, 6 * h:6 * h + c]      # classifier
    be = bvec[:, 0:h]
    b1 = bvec[:, h:2 * h]
    b2 = bvec[:, 2 * h:3 * h]
    bc = bvec[:, 3 * h:3 * h + c]

    # ---- embedder + fused QKV, batch folded into the MXU row dimension ----
    e = jnp.dot(x, we, preferred_element_type=jnp.float32) + be          # (bb*s, h) f32
    qkv = jnp.dot(e.astype(jnp.bfloat16), wqkv,
                  preferred_element_type=jnp.float32)                    # (bb*s, 3h) f32

    # batch back to a leading dim (tile-aligned sublane split; free per-batch indexing)
    e3 = e.reshape(bb, s, h)
    qkv3 = qkv.reshape(bb, s, 3 * h)
    q = qkv3[:, :, 0:h].astype(jnp.bfloat16)
    k = qkv3[:, :, h:2 * h].astype(jnp.bfloat16)
    v = qkv3[:, :, 2 * h:3 * h].astype(jnp.bfloat16)

    bias  = bp_ref[:, :, 0:s]         # additive causal + key-pad bias
    prior = bp_ref[:, :, s:2 * s]     # query-pad-weighted prior

    # ---- attention scores + numerically-stable softmax pieces (f32 elementwise) ----
    scores = jnp.einsum('bqd,bkd->bqk', q, k,
                        preferred_element_type=jnp.float32) + bias       # (bb, s, s)
    m = jnp.max(scores, axis=-1, keepdims=True)
    p = jnp.exp(scores - m)
    denom = jnp.sum(p, axis=-1, keepdims=True)

    # KL(prior || attn): log(attn) = (scores - m) - log(denom); padded-query rows
    # have prior == 0 (folded in the wrapper) so they contribute nothing.
    log_attn = (scores - m) - jnp.log(denom)
    kl_elem = prior * (jnp.log(prior + EPS) - log_attn)                  # (bb, s, s)
    kld = jnp.sum(jnp.sum(kl_elem, axis=-1), axis=-1, keepdims=True)     # (bb, 1)

    # ---- only the CLS row feeds the classifier: normalize/attend row 0 only ----
    attn0 = p[:, 0:1, :] * pl.reciprocal(denom[:, 0:1, :], approx=True)  # (bb, 1, s)
    ctx = jnp.einsum('bqk,bkd->bqd', attn0.astype(jnp.bfloat16), v,
                     preferred_element_type=jnp.float32)                 # (bb, 1, h)
    cls = (e3[:, 0:1, :] + ctx).reshape(bb, h)                           # residual

    # ---- position-wise FFN (CLS rows only) + residual ----
    f1 = jnp.maximum(jnp.dot(cls.astype(jnp.bfloat16), w1,
                             preferred_element_type=jnp.float32) + b1, 0.0)
    f2 = jnp.dot(f1.astype(jnp.bfloat16), w2,
                 preferred_element_type=jnp.float32) + b2
    hcls = cls + f2                                                      # (bb, h)

    # ---- classifier ----
    logits = jnp.dot(hcls.astype(jnp.bfloat16), wc,
                     preferred_element_type=jnp.float32) + bc            # (bb, c)

    # single store: logits in [0, C), per-batch KLD in column C
    out_ref[...] = jnp.concatenate([logits, kld], axis=1)                # (bb, c+1)


def init_params(key):
    assert F <= H, "packed weight slab assumes the embedder input dim fits in H rows"
    ks = jax.random.split(key, 7)

    def lin(k, fan_in, shape):
        return jax.random.normal(k, shape, jnp.float32) / jnp.sqrt(fan_in)

    we = lin(ks[0], F, (F, H))
    # fold the 1/sqrt(H) attention scale into the Q weights, fuse Q|K|V
    wq = lin(ks[1], H, (H, H)) * (1.0 / jnp.sqrt(jnp.float32(H)))
    wk = lin(ks[2], H, (H, H))
    wv = lin(ks[3], H, (H, H))
    w1 = lin(ks[4], H, (H, H))
    w2 = lin(ks[5], H, (H, H))
    wc = lin(ks[6], H, (H, C))

    we_p = jnp.zeros((H, H), jnp.float32).at[:F, :].set(we)   # pad embedder rows F->H
    w_slab = jnp.concatenate([we_p, wq, wk, wv, w1, w2, wc],
                             axis=1).astype(jnp.bfloat16)     # (H, 6H+C)
    b_slab = jnp.zeros((1, 3 * H + C), jnp.float32)           # be | b1 | b2 | bc
    return dict(w=w_slab, b=b_slab)


def _auto_num_blocks(batch):
    """2 batch blocks on v7x (2 TensorCores/chip), 1 on single-TC v5e/v6e."""
    try:
        kind = jax.devices()[0].device_kind.lower()
    except Exception:
        return 1
    if ("v7" in kind or "7x" in kind) and batch % 2 == 0:
        return 2
    return 1


@functools.partial(jax.jit, static_argnames="num_blocks")
def _gct_forward(x, pad_masks, causal_masks, priors, w_slab, b_slab, *, num_blocks):
    b, s, f = x.shape
    assert b % num_blocks == 0
    bb = b // num_blocks
    h = w_slab.shape[0]
    c = b_slab.shape[1] - 3 * h

    # Fold batch into the row dimension for the big matmuls; pad features to h so
    # the embedder weight lives in the packed (h, .) slab; bf16 feeds the MXU.
    x2d = x.reshape(b * s, f).astype(jnp.bfloat16)
    if f < h:
        x2d = jnp.pad(x2d, ((0, 0), (0, h - f)))
    # leading-axis blocking keeps every block's trailing dims == full dims (tile-clean)
    x3 = x2d.reshape(num_blocks, bb * s, h)

    # combined additive attention bias (causal AND key-padding) per batch element
    pad = pad_masks.astype(jnp.float32)                                    # (B, S)
    allowed = causal_masks.astype(jnp.float32)[None, :, :] * pad[:, None, :]
    attn_bias = jnp.where(allowed > 0.5, 0.0, NEG_INF).astype(jnp.float32)
    # query-padding folded into the prior (padded query rows -> zero KL contribution)
    prior_w = (priors * pad[:, :, None]).astype(jnp.float32)
    bp = jnp.concatenate([attn_bias, prior_w], axis=-1)                    # (B, S, 2S)

    in_specs = [
        pl.BlockSpec((None, bb * s, h), lambda i: (i, 0, 0)),     # x, batch-block leading
        pl.BlockSpec((bb, s, 2 * s), lambda i: (i, 0, 0)),        # bias | prior
        pl.BlockSpec(w_slab.shape, lambda i: (0, 0)),             # packed weights
        pl.BlockSpec(b_slab.shape, lambda i: (0, 0)),             # packed biases
    ]
    out_specs = pl.BlockSpec((None, bb, c + 1), lambda i: (i, 0, 0))
    out_shape = jax.ShapeDtypeStruct((num_blocks, bb, c + 1), jnp.float32)

    out = pl.pallas_call(
        gct_kernel,
        out_shape=out_shape,
        grid=(num_blocks,),
        in_specs=in_specs,
        out_specs=out_specs,
        compiler_params=pltpu.CompilerParams(
            dimension_semantics=("parallel",)),
    )(x3, bp, w_slab, b_slab)

    out2 = out.reshape(b, c + 1)
    logits = out2[:, :c]                    # (B, C)
    kld_loss = jnp.mean(out2[:, c])         # scalar, mean over batch (glue)
    return logits, kld_loss


def baseline_gct_forward(x, pad_masks, causal_masks, priors, params, num_blocks=None):
    if num_blocks is None:
        num_blocks = _auto_num_blocks(x.shape[0])
    return _gct_forward(x, pad_masks, causal_masks, priors,
                        params["w"], params["b"], num_blocks=num_blocks)


if __name__ == "__main__":
    key = jax.random.PRNGKey(0)
    k_x, k_prior, k_param = jax.random.split(key, 3)

    x = jax.random.normal(k_x, (B, S, F), jnp.float32)

    # pad mask: batch 0 fully valid, batch 1 has last two tokens padded
    pad_masks = jnp.ones((B, S), jnp.float32)
    pad_masks = pad_masks.at[1, S - 2:].set(0.0)

    # lower-triangular causal mask
    causal_masks = jnp.tril(jnp.ones((S, S), jnp.float32))

    # row-stochastic priors restricted to the causal support
    prior_logits = jax.random.normal(k_prior, (B, S, S), jnp.float32)
    prior_logits = jnp.where(causal_masks[None] > 0.5, prior_logits, NEG_INF)
    priors = jax.nn.softmax(prior_logits, axis=-1)

    params = init_params(k_param)

    logits, kld_loss = baseline_gct_forward(x, pad_masks, causal_masks,
                                            priors, params)
    jax.block_until_ready((logits, kld_loss))

    assert logits.shape == (B, C)
    assert kld_loss.shape == ()
    assert jnp.all(jnp.isfinite(logits)) and jnp.isfinite(kld_loss)
    print("KERNEL_OK")
</pallas_src>

<mosaic_0001>
module attributes {stable_mosaic.version = 11 : i64} {
  func.func @gct_kernel(%arg0: i32, %arg1: memref<1x16x32xbf16, #tpu.memory_space<vmem>>, %arg2: memref<2x8x16xf32, #tpu.memory_space<vmem>>, %arg3: memref<32x196xbf16, #tpu.memory_space<vmem>>, %arg4: memref<1x100xf32, #tpu.memory_space<vmem>>, %arg5: memref<1x2x5xf32, #tpu.memory_space<vmem>>) attributes {dimension_semantics = [#tpu.dimension_semantics<parallel>], iteration_bounds = array<i64: 1>, scalar_prefetch = 0 : i64, scratch_operands = 0 : i64, tpu.core_type = #tpu.core_type<tc>, window_params = [{transform_indices = @transform_0, window_bounds = array<i64: 1, 16, 32>}, {transform_indices = @transform_1, window_bounds = array<i64: 2, 8, 16>}, {pipeline_mode = #tpu.pipeline_mode<synchronous>, transform_indices = @transform_2, window_bounds = array<i64: 32, 196>}, {pipeline_mode = #tpu.pipeline_mode<synchronous>, transform_indices = @transform_3, window_bounds = array<i64: 1, 100>}, {transform_indices = @transform_4, window_bounds = array<i64: 1, 2, 5>}]} {
    %c0 = arith.constant 0 : index
    %c0_0 = arith.constant 0 : index
    %c0_1 = arith.constant 0 : index
    %0 = vector.load %arg1[%c0, %c0_0, %c0_1] : memref<1x16x32xbf16, #tpu.memory_space<vmem>>, vector<1x16x32xbf16>
    %1 = vector.shape_cast %0 : vector<1x16x32xbf16> to vector<16x32xbf16>
    %c0_2 = arith.constant 0 : index
    %c0_3 = arith.constant 0 : index
    %2 = vector.load %arg3[%c0_2, %c0_3] : memref<32x196xbf16, #tpu.memory_space<vmem>>, vector<32x196xbf16>
    %c0_4 = arith.constant 0 : index
    %c0_5 = arith.constant 0 : index
    %3 = vector.load %arg4[%c0_4, %c0_5] : memref<1x100xf32, #tpu.memory_space<vmem>>, vector<1x100xf32>
    %4 = vector.extract_strided_slice %2 {offsets = [0, 0], sizes = [32, 32], strides = [1, 1]} : vector<32x196xbf16> to vector<32x32xbf16>
    %5 = vector.extract_strided_slice %2 {offsets = [0, 32], sizes = [32, 96], strides = [1, 1]} : vector<32x196xbf16> to vector<32x96xbf16>
    %6 = vector.extract_strided_slice %2 {offsets = [0, 128], sizes = [32, 32], strides = [1, 1]} : vector<32x196xbf16> to vector<32x32xbf16>
    %7 = vector.extract_strided_slice %2 {offsets = [0, 160], sizes = [32, 32], strides = [1, 1]} : vector<32x196xbf16> to vector<32x32xbf16>
    %8 = vector.extract_strided_slice %2 {offsets = [0, 192], sizes = [32, 4], strides = [1, 1]} : vector<32x196xbf16> to vector<32x4xbf16>
    %9 = vector.extract_strided_slice %3 {offsets = [0, 0], sizes = [1, 32], strides = [1, 1]} : vector<1x100xf32> to vector<1x32xf32>
    %10 = vector.extract_strided_slice %3 {offsets = [0, 32], sizes = [1, 32], strides = [1, 1]} : vector<1x100xf32> to vector<1x32xf32>
    %11 = vector.extract_strided_slice %3 {offsets = [0, 64], sizes = [1, 32], strides = [1, 1]} : vector<1x100xf32> to vector<1x32xf32>
    %12 = vector.extract_strided_slice %3 {offsets = [0, 96], sizes = [1, 4], strides = [1, 1]} : vector<1x100xf32> to vector<1x4xf32>
    %cst = arith.constant dense<0.000000e+00> : vector<16x32xf32>
    %13 = tpu.matmul %1, %4, %cst {dimension_numbers = #tpu.dot_dimension_numbers<[1], [0], [0], [1], [0, 0, 1, 1], [], []>} : vector<16x32xbf16>, vector<32x32xbf16>, vector<16x32xf32> -> vector<16x32xf32>
    %14 = vector.broadcast %9 : vector<1x32xf32> to vector<16x32xf32>
    %15 = arith.addf %13, %14 : vector<16x32xf32>
    %16 = arith.truncf %15 : vector<16x32xf32> to vector<16x32xbf16>
    %cst_6 = arith.constant dense<0.000000e+00> : vector<16x96xf32>
    %17 = tpu.matmul %16, %5, %cst_6 {dimension_numbers = #tpu.dot_dimension_numbers<[1], [0], [0], [1], [0, 0, 1, 1], [], []>} : vector<16x32xbf16>, vector<32x96xbf16>, vector<16x96xf32> -> vector<16x96xf32>
    %18 = vector.shape_cast %15 : vector<16x32xf32> to vector<2x8x32xf32>
    %19 = vector.shape_cast %17 : vector<16x96xf32> to vector<2x8x96xf32>
    %20 = vector.extract_strided_slice %19 {offsets = [0, 0, 0], sizes = [2, 8, 32], strides = [1, 1, 1]} : vector<2x8x96xf32> to vector<2x8x32xf32>
    %21 = arith.truncf %20 : vector<2x8x32xf32> to vector<2x8x32xbf16>
    %22 = vector.extract_strided_slice %19 {offsets = [0, 0, 32], sizes = [2, 8, 32], strides = [1, 1, 1]} : vector<2x8x96xf32> to vector<2x8x32xf32>
    %23 = arith.truncf %22 : vector<2x8x32xf32> to vector<2x8x32xbf16>
    %24 = vector.extract_strided_slice %19 {offsets = [0, 0, 64], sizes = [2, 8, 32], strides = [1, 1, 1]} : vector<2x8x96xf32> to vector<2x8x32xf32>
    %25 = arith.truncf %24 : vector<2x8x32xf32> to vector<2x8x32xbf16>
    %c0_7 = arith.constant 0 : index
    %c0_8 = arith.constant 0 : index
    %c0_9 = arith.constant 0 : index
    %26 = vector.load %arg2[%c0_7, %c0_8, %c0_9] : memref<2x8x16xf32, #tpu.memory_space<vmem>>, vector<2x8x8xf32>
    %c0_10 = arith.constant 0 : index
    %c0_11 = arith.constant 0 : index
    %c8 = arith.constant 8 : index
    %27 = vector.load %arg2[%c0_10, %c0_11, %c8] : memref<2x8x16xf32, #tpu.memory_space<vmem>>, vector<2x8x8xf32>
    "tpu.trace_start"() <{level = 10 : i32, message = "bqd,bkd->bqk"}> : () -> ()
    %cst_12 = arith.constant dense<0.000000e+00> : vector<2x8x8xf32>
    %28 = tpu.matmul %21, %23, %cst_12 {dimension_numbers = #tpu.dot_dimension_numbers<[2], [2], [1], [1], [0, 0, 0, 1, 1, 1], [0], [0]>} : vector<2x8x32xbf16>, vector<2x8x32xbf16>, vector<2x8x8xf32> -> vector<2x8x8xf32>
    "tpu.trace_stop"() : () -> ()
    %29 = arith.addf %28, %26 : vector<2x8x8xf32>
    %cst_13 = arith.constant dense<0xFF800000> : vector<2x8xf32>
    %30 = vector.multi_reduction <maximumf>, %29, %cst_13 [2] : vector<2x8x8xf32> to vector<2x8xf32>
    %31 = vector.shape_cast %30 : vector<2x8xf32> to vector<2x8x1xf32>
    %32 = vector.broadcast %31 : vector<2x8x1xf32> to vector<2x8x8xf32>
    %33 = arith.subf %29, %32 : vector<2x8x8xf32>
    %34 = math.exp %33 : vector<2x8x8xf32>
    %cst_14 = arith.constant dense<0.000000e+00> : vector<2x8xf32>
    %35 = vector.multi_reduction <add>, %34, %cst_14 [2] : vector<2x8x8xf32> to vector<2x8xf32>
    %36 = vector.shape_cast %35 : vector<2x8xf32> to vector<2x8x1xf32>
    %37 = vector.broadcast %31 : vector<2x8x1xf32> to vector<2x8x8xf32>
    %38 = arith.subf %29, %37 : vector<2x8x8xf32>
    %39 = math.log %36 : vector<2x8x1xf32>
    %40 = vector.broadcast %39 : vector<2x8x1xf32> to vector<2x8x8xf32>
    %41 = arith.subf %38, %40 : vector<2x8x8xf32>
    %cst_15 = arith.constant 9.99999993E-9 : f32
    %42 = vector.broadcast %cst_15 : f32 to vector<2x8x8xf32>
    %43 = arith.addf %27, %42 : vector<2x8x8xf32>
    %44 = math.log %43 : vector<2x8x8xf32>
    %45 = arith.subf %44, %41 : vector<2x8x8xf32>
    %46 = arith.mulf %27, %45 : vector<2x8x8xf32>
    %cst_16 = arith.constant dense<0.000000e+00> : vector<2x8xf32>
    %47 = vector.multi_reduction <add>, %46, %cst_16 [2] : vector<2x8x8xf32> to vector<2x8xf32>
    %cst_17 = arith.constant dense<0.000000e+00> : vector<2xf32>
    %48 = vector.multi_reduction <add>, %47, %cst_17 [1] : vector<2x8xf32> to vector<2xf32>
    %49 = vector.shape_cast %48 : vector<2xf32> to vector<2x1xf32>
    %50 = vector.extract_strided_slice %34 {offsets = [0, 0, 0], sizes = [2, 1, 8], strides = [1, 1, 1]} : vector<2x8x8xf32> to vector<2x1x8xf32>
    %51 = vector.extract_strided_slice %36 {offsets = [0, 0, 0], sizes = [2, 1, 1], strides = [1, 1, 1]} : vector<2x8x1xf32> to vector<2x1x1xf32>
    %52 = tpu.reciprocal %51 {approx = true} : vector<2x1x1xf32> -> vector<2x1x1xf32>
    %53 = vector.broadcast %52 : vector<2x1x1xf32> to vector<2x1x8xf32>
    %54 = arith.mulf %50, %53 : vector<2x1x8xf32>
    %55 = arith.truncf %54 : vector<2x1x8xf32> to vector<2x1x8xbf16>
    "tpu.trace_start"() <{level = 10 : i32, message = "bqk,bkd->bqd"}> : () -> ()
    %cst_18 = arith.constant dense<0.000000e+00> : vector<2x1x32xf32>
    %56 = tpu.matmul %55, %25, %cst_18 {dimension_numbers = #tpu.dot_dimension_numbers<[2], [1], [1], [2], [0, 0, 0, 1, 1, 2], [0], [0]>} : vector<2x1x8xbf16>, vector<2x8x32xbf16>, vector<2x1x32xf32> -> vector<2x1x32xf32>
    "tpu.trace_stop"() : () -> ()
    %57 = vector.extract_strided_slice %18 {offsets = [0, 0, 0], sizes = [2, 1, 32], strides = [1, 1, 1]} : vector<2x8x32xf32> to vector<2x1x32xf32>
    %58 = arith.addf %57, %56 : vector<2x1x32xf32>
    %59 = vector.shape_cast %58 : vector<2x1x32xf32> to vector<2x32xf32>
    %60 = arith.truncf %59 : vector<2x32xf32> to vector<2x32xbf16>
    %cst_19 = arith.constant dense<0.000000e+00> : vector<2x32xf32>
    %61 = tpu.matmul %60, %6, %cst_19 {dimension_numbers = #tpu.dot_dimension_numbers<[1], [0], [0], [1], [0, 0, 1, 1], [], []>} : vector<2x32xbf16>, vector<32x32xbf16>, vector<2x32xf32> -> vector<2x32xf32>
    %62 = vector.broadcast %10 : vector<1x32xf32> to vector<2x32xf32>
    %63 = arith.addf %61, %62 : vector<2x32xf32>
    %cst_20 = arith.constant 0.000000e+00 : f32
    %64 = vector.broadcast %cst_20 : f32 to vector<2x32xf32>
    %65 = arith.maximumf %63, %64 : vector<2x32xf32>
    %66 = arith.truncf %65 : vector<2x32xf32> to vector<2x32xbf16>
    %cst_21 = arith.constant dense<0.000000e+00> : vector<2x32xf32>
    %67 = tpu.matmul %66, %7, %cst_21 {dimension_numbers = #tpu.dot_dimension_numbers<[1], [0], [0], [1], [0, 0, 1, 1], [], []>} : vector<2x32xbf16>, vector<32x32xbf16>, vector<2x32xf32> -> vector<2x32xf32>
    %68 = vector.broadcast %11 : vector<1x32xf32> to vector<2x32xf32>
    %69 = arith.addf %67, %68 : vector<2x32xf32>
    %70 = arith.addf %59, %69 : vector<2x32xf32>
    %71 = arith.truncf %70 : vector<2x32xf32> to vector<2x32xbf16>
    %cst_22 = arith.constant dense<0.000000e+00> : vector<2x4xf32>
    %72 = tpu.matmul %71, %8, %cst_22 {dimension_numbers = #tpu.dot_dimension_numbers<[1], [0], [0], [1], [0, 0, 1, 1], [], []>} : vector<2x32xbf16>, vector<32x4xbf16>, vector<2x4xf32> -> vector<2x4xf32>
    %73 = vector.broadcast %12 : vector<1x4xf32> to vector<2x4xf32>
    %74 = arith.addf %72, %73 : vector<2x4xf32>
    %75 = tpu.concatenate %74, %49 in 1 : vector<2x4xf32>, vector<2x1xf32> -> vector<2x5xf32>
    %c0_23 = arith.constant 0 : index
    %c0_24 = arith.constant 0 : index
    %c0_25 = arith.constant 0 : index
    %76 = vector.load %arg5[%c0_23, %c0_24, %c0_25] : memref<1x2x5xf32, #tpu.memory_space<vmem>>, vector<1x2x5xf32>
    %77 = vector.shape_cast %76 : vector<1x2x5xf32> to vector<2x5xf32>
    %78 = vector.shape_cast %75 : vector<2x5xf32> to vector<1x2x5xf32>
    tpu.vector_store %arg5[%c0_23, %c0_24, %c0_25], %78 {strides = array<i32>} : memref<1x2x5xf32, #tpu.memory_space<vmem>>, vector<1x2x5xf32>,
    return
  }
  func.func @transform_0(%arg0: i32) -> (i32, i32, i32) {
    %c0_i32 = arith.constant 0 : i32
    %c0_i32_0 = arith.constant 0 : i32
    %c0_i32_1 = arith.constant 0 : i32
    return %arg0, %c0_i32, %c0_i32_0 : i32, i32, i32
  }
  func.func @transform_1(%arg0: i32) -> (i32, i32, i32) {
    %c0_i32 = arith.constant 0 : i32
    %c0_i32_0 = arith.constant 0 : i32
    %c0_i32_1 = arith.constant 0 : i32
    return %arg0, %c0_i32, %c0_i32_0 : i32, i32, i32
  }
  func.func @transform_2(%arg0: i32) -> (i32, i32) {
    %c0_i32 = arith.constant 0 : i32
    %c0_i32_0 = arith.constant 0 : i32
    %c0_i32_1 = arith.constant 0 : i32
    return %c0_i32, %c0_i32_0 : i32, i32
  }
  func.func @transform_3(%arg0: i32) -> (i32, i32) {
    %c0_i32 = arith.constant 0 : i32
    %c0_i32_0 = arith.constant 0 : i32
    %c0_i32_1 = arith.constant 0 : i32
    return %c0_i32, %c0_i32_0 : i32, i32
  }
  func.func @transform_4(%arg0: i32) -> (i32, i32, i32) {
    %c0_i32 = arith.constant 0 : i32
    %c0_i32_0 = arith.constant 0 : i32
    %c0_i32_1 = arith.constant 0 : i32
    return %arg0, %c0_i32, %c0_i32_0 : i32, i32, i32
  }
}

</mosaic_0001>

<bundles_post_ra>
// kernel: _gct_forward.1
= control target key start
LH: loop header
LB: loop body
LE: loop exit
PB: predicated region body
PF: predicated region fallthrough
CT: control target
= control target key end

     0   :  { %v751_v0 = vmov 0.0   ;;  %vm752_vm0 = vmmov 0   ;;  %s753_s19 = smov 96   ;;  %vm48_vm1 = vcmask 261120   ;;  %vm246_vm2 = vcmask 64512   ;;  %s754_s28 = smov 64   ;;  %s899_s2 = inlined_call_operand.vmem [shape: bf16[32,196], index: 2, kind: input, shape index: {}]   ;;  %s900_s0 = inlined_call_operand.vmem [shape: bf16[1,16,32], index: 0, kind: input, shape index: {}]   ;;  %s901_s3 = inlined_call_operand.vmem [shape: f32[1,100], index: 3, kind: input, shape index: {}]   ;;  %s902_s1 = inlined_call_operand.vmem [shape: f32[2,8,16], index: 1, kind: input, shape index: {}]   ;;  %s903_s4 = inlined_call_operand.vmem [shape: f32[1,2,5], index: 4, kind: output, shape index: {}]  }
   0x1   :  { %657 = vmatprep.subr.bf16.mxu0 %v751_v0  ;;  %v728_v1 = vld [vmem:[%s899_s2] ss:$8 sps:$4 sm:$0xff]   ;;  %661 = vmatprep.mubr.msk.bf16.mxu0 %vm752_vm0, %v751_v0  ;;  %v731_v2 = vld [vmem:[%s899_s2 + $0x10] ss:$8 sps:$4 sm:$0xff]   ;;  %v730_v38 = vld [vmem:[%s899_s2 + $0x4] ss:$8 sps:$4 sm:$0xff]  }
   0x2   :  { %665 = vmatprep.subr.bf16.mxu1 %v751_v0  ;;  %669 = vmatprep.mubr.msk.bf16.mxu1 %vm752_vm0, %v751_v0  ;;  %v733_v3 = vld [vmem:[%s900_s0] sm:$0xff]   ;;  %v838_v24 = vld [vmem:[%s902_s1 + $0x8] sm:$0xff]  ;;  %vm333_vm3 = vcmask 1043456   ;;  %v734_v51 = vld [vmem:[%s899_s2 + $0x14] ss:$8 sps:$4 sm:$0xff]   ;;  %s755_s2 = smov 8  }
   0x3   :  { %658 = vmatpush3.bf16.msra.mxu0 %v728_v1  ;;  %94 = vrot.lane.b32.xlu0 %v728_v1, %s753_s19  ;;  %v810_v6 = vld [vmem:[%s901_s3] ss:$0 sm:$0xff]  ;;  %s756_s30 = smov 120   ;;  %vm315_vm4 = vcmask 1041409   ;;  %vm318_vm5 = vcmask 58368   ;;  %s757_s5 = smov 32  }
   0x4   :  { %659 = vmatprep.subr.bf16.mxu0 %v751_v0  ;;  %v844_v29 = vld [vmem:[%s902_s1] sm:$0xff]  ;;  %vm611_vm6 = vcmask 31744   ;;  %vm613_vm7 = vcmask 33792  }
   0x7   :  { %660 = vmatpush3.bf16.msra.mxu0 %v731_v2  ;;  %96 = vrot.lane.b32.xlu0 %v731_v2, %s753_s19 }
   0x8   :  { %673 = vmatprep.subr.bf16.mxu0 %v751_v0 }
   0xa   :  { %662 = vmatmul.mubr.msk.bf16.vlgmr.msra.gmra.mrb[0].mxu0 %vm48_vm1, %v733_v3 }
   0xb   :  { %675 = vmatprep.mubr.msk.bf16.mxu0 %vm752_vm0, %v751_v0 }
  0x75   :  { %v95_v4 = vpop.permute.xlu0 %94 }
  0x76   :  { %666 = vmatpush3.bf16.msra.mxu1 %v95_v4 }
  0x77   :  { %667 = vmatprep.subr.bf16.mxu1 %v751_v0 }
  0x79   :  { %v97_v5 = vpop.permute.xlu0 %96 }
  0x7a   :  { %668 = vmatpush3.bf16.msra.mxu1 %v97_v5 }
  0x7b   :  { %679 = vmatprep.subr.bf16.mxu1 %v751_v0 }
  0xdd   :  { %v86_v7 = vpop.f32.mrb[0].mxu0 }
  0xde   :  { %v663_v8 = vpop.f32.mrb[1].mxu0  ;;  %v813_v10 = vadd.f32 %v810_v6, %v86_v7 }
  0xdf   :  { %v89_v9 = vpop.f32.mrb[2].mxu0  ;;  %v271_v8 = vadd.f32 1e-08, %v844_v29 }
  0xe0   :  { %v816_v11 = vadd.f32 %v810_v6, %v89_v9  ;;  %v664_v12 = vpop.f32.mrb[3].mxu0  ;;  %v272_v9 = vadd.f32 1e-08, %v838_v24 }
  0xe2   :  { %v93_v13 = vpack.c.bf16 %v816_v11, %v813_v10 }
  0xe4   :  { %670 = vmatmul.mubr.msk.bf16.vlgmr.msra.gmra.mrb[0].mxu1 %vm48_vm1, %v93_v13 }
  0xe5   :  { %681 = vmatprep.mubr.msk.bf16.mxu1 %vm752_vm0, %v751_v0 }
 0x1b7   :  { %v137_v14 = vpop.f32.mrb[0].mxu1 }
 0x1b8   :  { %v671_v15 = vpop.f32.mrb[1].mxu1  ;;  %v144_v19 = vpack.c.bf16 %v137_v14, %v137_v14 }
 0x1b9   :  { %v140_v16 = vpop.f32.mrb[2].mxu1 }
 0x1ba   :  { %v145_v17 = vpack.c.bf16 %v140_v16, %v140_v16  ;;  %v672_v18 = vpop.f32.mrb[3].mxu1 }
 0x1bc   :  { %198 = vrot.lane.b32.xlu1 %v145_v17, %s753_s19 }
 0x1c0   :  { %149 = vrot.lane.b32.xlu1 %v144_v19, %s753_s19 }
 0x22e   :  { %v199_v20 = vpop.permute.xlu1 %198 }
 0x22f   :  { %v204_v21 = vsel %vm48_vm1, %v199_v20, 0 }
 0x230   :  { %680 = vmatpush3.bf16.xpose.msra.mxu1 %v204_v21 }
 0x231   :  { %691 = vmatprep.subr.bf16.mxu1 %v751_v0 }
 0x232   :  { %v150_v22 = vpop.permute.xlu1 %149 }
 0x233   :  { %v155_v23 = vsel %vm48_vm1, %v150_v22, 0 }
 0x234   :  { %674 = vmatpush3.bf16.xpose.msra.mxu0 %v155_v23 }
 0x235   :  { %685 = vmatprep.subr.bf16.mxu0 %v751_v0 }
 0x237   :  { %682 = vmatmul.mubr.msk.bf16.vlgmr.msra.gmra.mrb[4].mxu1 %vm48_vm1, %v145_v17 }
 0x238   :  { %693 = vmatprep.mubr.msk.bf16.mxu1 %vm752_vm0, %v751_v0 }
 0x23b   :  { %676 = vmatmul.mubr.msk.bf16.vlgmr.msra.gmra.mrb[4].mxu0 %vm48_vm1, %v144_v19 }
 0x23c   :  { %687 = vmatprep.mubr.msk.bf16.mxu0 %vm752_vm0, %v751_v0 }
 0x30a   :  { %v240_v25 = vpop.f32.mrb[4].mxu1 }
 0x30b   :  { %v241_v26 = vadd.f32 %v240_v25, %v838_v24  ;;  %v683_v27 = vpop.f32.mrb[5].mxu1 }
 0x30c   :  { %v243_v28 = vpop.f32.mrb[6].mxu1 }
 0x30d   :  { %v684_v30 = vpop.f32.mrb[7].mxu1  ;;  %v250_v31 = vsel %vm246_vm2, %v241_v26, -inf }
 0x30e   :  { %251 = vmax.xlane.f32.xlu0 %v250_v31  ;;  %v191_v32 = vpop.f32.mrb[4].mxu0 }
 0x30f   :  { %v192_v33 = vadd.f32 %v191_v32, %v844_v29  ;;  %v677_v34 = vpop.f32.mrb[5].mxu0 }
 0x310   :  { %v194_v35 = vpop.f32.mrb[6].mxu0 }
 0x311   :  { %v678_v36 = vpop.f32.mrb[7].mxu0  ;;  %v247_v37 = vsel %vm246_vm2, %v192_v33, -inf }
 0x312   :  { %248 = vmax.xlane.f32.xlu1 %v247_v37 }
 0x323   :  { %377 = vrot.lane.b32.xlu1 %v145_v17, %s754_s28 }
 0x327   :  { %492 = vrot.lane.b32.xlu1 %v730_v38, %s753_s19 }
 0x32b   :  { %444 = vrot.lane.b32.xlu1 %v810_v6, %s753_s19 }
 0x32f   :  { %498 = vrot.lane.b32.xlu1 %v810_v6, %s754_s28 }
 0x333   :  { %561 = vrot.lane.b32.xlu1 %v734_v51, %s754_s28 }
 0x39b   :  { %v252_v39 = vpop.xlane.xlu0 %251 }
 0x39c   :  { %v254_v40 = vsub.f32 %v241_v26, %v252_v39 }
 0x39e   :  { %v257_v43 = vmul.f32 1.442695, %v254_v40 }
 0x39f   :  { %v249_v41 = vpop.xlane.xlu1 %248 }
 0x3a0   :  { %v253_v42 = vsub.f32 %v192_v33, %v249_v41 }
 0x3a2   :  { %v255_v44 = vmul.f32 1.442695, %v253_v42 }
 0x3a3   :  { %v378_v45 = vpop.permute.xlu1 %377 }
 0x3a4   :  { %735 = vpow2.f32 %v255_v44  ;;  %v383_v46 = vsel %vm333_vm3, %v378_v45, 0  ;;  %v305_v45 = vlaneseq }
 0x3a5   :  { %692 = vmatpush3.bf16.msra.mxu1 %v383_v46  ;;  %737 = vpow2.f32 %v257_v43 }
 0x3a6   :  { %705 = vmatprep.subr.bf16.mxu1 %v751_v0  ;;  %v306_v46 = vand.u32 127, %v305_v45 }
 0x3a7   :  { %v493_v5 = vpop.permute.xlu1 %492 }
 0x3ab   :  { %v445_v12 = vpop.permute.xlu1 %444 }
 0x3ae   :  { %v736_v47 = vpop.eup %735 }
 0x3af   :  { %v259_v48 = vsel %vm246_vm2, %v736_v47, 0.0  ;;  %v738_v49 = vpop.eup %737  ;;  %v877_v13 = vpop.permute.xlu1 %498 }
 0x3b0   :  { %260 = vadd.xlane.f32.xlu0 %v259_v48  ;;  %v262_v50 = vsel %vm246_vm2, %v738_v49, 0.0 }
 0x3b3   :  { %v562_v18 = vpop.permute.xlu1 %561 }
 0x3b4   :  { %263 = vadd.xlane.f32.xlu0 %v262_v50 }
 0x3ca   :  { %328 = vrot.lane.b32.xlu0 %v144_v19, %s754_s28 }
 0x3ce   :  { %494 = vrot.lane.b32.xlu0 %v734_v51, %s753_s19 }
 0x3d2   :  { %559 = vrot.lane.b32.xlu0 %v730_v38, %s754_s28 }
 0x43d   :  { %v261_v52 = vpop.xlane.xlu0 %260 }
 0x43e   :  { %739 = vlog2.f32 %v261_v52 }
 0x43f   :  { %741 = vrcp.f32 %v261_v52 }
 0x441   :  { %v264_v53 = vpop.xlane.xlu0 %263 }
 0x442   :  { %743 = vlog2.f32 %v264_v53 }
 0x443   :  { %745 = vrcp.f32 %v264_v53 }
 0x444   :  { %747 = vlog2.f32 %v271_v8 }
 0x445   :  { %v329_v54 = vpop.permute.xlu0 %328  ;;  %749 = vlog2.f32 %v272_v9 }
 0x446   :  { %v335_v55 = vsel %vm333_vm3, %v329_v54, 0 }
 0x447   :  { %686 = vmatpush3.bf16.msra.mxu0 %v335_v55 }
 0x448   :  { %v740_v56 = vpop.eup %739  ;;  %697 = vmatprep.subr.bf16.mxu0 %v751_v0 }
 0x449   :  { %v742_v57 = vpop.eup %741  ;;  %v266_v58 = vmul.f32 0.6931472, %v740_v56  ;;  %v495_v7 = vpop.permute.xlu0 %494 }
 0x44a   :  { %v324_v59 = vmul.f32 %v742_v57, %v736_v47  ;;  %v308_v47 = vshrl.u32 %v305_v45, 7 }
 0x44b   :  { %v269_v60 = vsub.f32 %v253_v42, %v266_v58 }
 0x44c   :  { %v744_v61 = vpop.eup %743  ;;  %v326_v62 = vpack.c.bf16 %v324_v59, %v324_v59  ;;  %v309_v48 = vsub.s32 %v306_v46, %v308_v47 }
 0x44d   :  { %v746_v63 = vpop.eup %745  ;;  %v268_v1 = vmul.f32 0.6931472, %v744_v61  ;;  %279 = vrot.lane.b32.xlu0 %v269_v60, %s755_s2  ;;  %v560_v15 = vpop.permute.xlu0 %559 }
 0x44e   :  { %688 = vmatmul.mubr.msk.bf16.vlgmr.msra.gmra.mrb[8].mxu0 %vm246_vm2, %v326_v62  ;;  %v325_v2 = vmul.f32 %v746_v63, %v738_v49  ;;  %v748_v14 = vpop.eup %747 }
 0x44f   :  { %v270_v3 = vsub.f32 %v254_v40, %v268_v1  ;;  %698 = vmatpush3.bf16.msra.mxu0 %v730_v38  ;;  %701 = vmatprep.mubr.msk.bf16.mxu0 %vm752_vm0, %v751_v0  ;;  %v274_v16 = vmul.f32 0.6931472, %v748_v14  ;;  %v750_v17 = vpop.eup %749 }
 0x450   :  { %v327_v4 = vpack.c.bf16 %v325_v2, %v325_v2  ;;  %699 = vmatprep.subr.bf16.mxu0 %v751_v0  ;;  %v276_v21 = vmul.f32 0.6931472, %v750_v17 }
 0x451   :  { %281 = vrot.lane.b32.xlu1 %v270_v3, %s755_s2 }
 0x452   :  { %694 = vmatmul.mubr.msk.bf16.vlgmr.msra.gmra.mrb[8].mxu1 %vm246_vm2, %v327_v4 }
 0x453   :  { %700 = vmatpush3.bf16.msra.mxu0 %v734_v51  ;;  %706 = vmatpush3.bf16.msra.mxu1 %v493_v5 }
 0x454   :  { %707 = vmatprep.subr.bf16.mxu1 %v751_v0  ;;  %709 = vmatprep.mubr.msk.bf16.mxu1 %vm752_vm0, %v751_v0 }
 0x455   :  { %713 = vmatprep.subr.bf16.mxu0 %v751_v0 }
 0x457   :  { %708 = vmatpush3.bf16.msra.mxu1 %v495_v7 }
 0x4bf   :  { %v280_v19 = vpop.permute.xlu0 %279 }
 0x4c0   :  { %v285_v20 = vsub.f32 %v274_v16, %v280_v19 }
 0x4c2   :  { %v287_v22 = vmul.f32 %v285_v20, %v844_v29 }
 0x4c3   :  { %v282_v23 = vpop.permute.xlu1 %281 }
 0x4c4   :  { %v286_v25 = vsub.f32 %v276_v21, %v282_v23  ;;  %291 = vrot.lane.b32.xlu0 %v287_v22, %s756_s30 }
 0x4c6   :  { %v288_v26 = vmul.f32 %v286_v25, %v838_v24 }
 0x4c8   :  { %293 = vrot.lane.b32.xlu1 %v288_v26, %s756_s30 }
 0x521   :  { %v371_v27 = vpop.f32.mrb[8].mxu0 }
 0x522   :  { %v689_v28 = vpop.f32.mrb[9].mxu0  ;;  %v425_v31 = vadd.f32 %v371_v27, %v813_v10 }
 0x523   :  { %v374_v30 = vpop.f32.mrb[10].mxu0 }
 0x524   :  { %v690_v32 = vpop.f32.mrb[11].mxu0  ;;  %v427_v37 = vpack.c.bf16 %v425_v31, %v425_v31 }
 0x525   :  { %v419_v33 = vpop.f32.mrb[8].mxu1 }
 0x526   :  { %v426_v34 = vadd.f32 %v419_v33, %v816_v11  ;;  %v695_v35 = vpop.f32.mrb[9].mxu1  ;;  %v431_v40 = vunpack.c.l.b16 %v427_v37 }
 0x527   :  { %v422_v36 = vpop.f32.mrb[10].mxu1 }
 0x528   :  { %v428_v29 = vpack.c.bf16 %v426_v34, %v426_v34  ;;  %v696_v38 = vpop.f32.mrb[11].mxu1 }
 0x52a   :  { %v432_v39 = vunpack.c.l.b16 %v428_v29 }
 0x52c   :  { %v433_v41 = vrot.slane %v432_v39, 7 }
 0x52e   :  { %v434_v24 = vsel %vm315_vm4, %v433_v41, %v431_v40 }
 0x52f   :  { %v435_v42 = vpack.c.b16 %v434_v24, %v434_v24 }
 0x531   :  { %702 = vmatmul.mubr.msk.bf16.vlgmr.msra.gmra.mrb[12].mxu0 %vm48_vm1, %v435_v42 }
 0x532   :  { %714 = vmatpush3.bf16.msra.mxu0 %v560_v15  ;;  %717 = vmatprep.mubr.msk.bf16.mxu0 %vm752_vm0, %v751_v0 }
 0x533   :  { %715 = vmatprep.subr.bf16.mxu0 %v751_v0 }
 0x536   :  { %v292_v10 = vpop.permute.xlu0 %291  ;;  %716 = vmatpush3.bf16.msra.mxu0 %v562_v18 }
 0x537   :  { %v297_v11 = vsel %vm246_vm2, %v292_v10, 0.0 }
 0x538   :  { %298 = vadd.xlane.f32.xlu0 %v297_v11 }
 0x53a   :  { %v294_v43 = vpop.permute.xlu1 %293 }
 0x53b   :  { %v300_v44 = vsel %vm246_vm2, %v294_v43, 0.0 }
 0x53c   :  { %301 = vadd.xlane.f32.xlu1 %v300_v44 }
 0x5c5   :  { %v299_v49 = vpop.xlane.xlu0 %298 }
 0x5c6   :  { %v310_v51 = vrot.slane %v299_v49, %v309_v48 }
 0x5c9   :  { %v302_v50 = vpop.xlane.xlu1 %301 }
 0x5ca   :  { %v314_v52 = vrot.slane %v302_v50, %v309_v48 }
 0x5cc   :  { %v316_v0 = vsel %vm315_vm4, %v314_v52, %v310_v51 }
 0x5cd   :  { %v319_v53 = vsel %vm318_vm5, %v316_v0, 0.0 }
 0x5ce   :  { %320 = vadd.xlane.f32.xlu0 %v319_v53 }
 0x5e4   :  { %565 = vrot.lane.b32.xlu0 %v810_v6, %s757_s5 }
 0x604   :  { %v484_v54 = vpop.f32.mrb[12].mxu0 }
 0x605   :  { %v485_v55 = vadd.f32 %v484_v54, %v445_v12  ;;  %v703_v56 = vpop.f32.mrb[13].mxu0 }
 0x606   :  { %v487_v57 = vpop.f32.mrb[14].mxu0 }
 0x607   :  { %v490_v58 = vmax.f32 %v485_v55, 0.0  ;;  %v704_v59 = vpop.f32.mrb[15].mxu0 }
 0x609   :  { %v491_v60 = vpack.c.bf16 %v490_v58, %v490_v58 }
 0x60b   :  { %710 = vmatmul.mubr.msk.bf16.vlgmr.msra.gmra.mrb[12].mxu1 %vm48_vm1, %v491_v60 }
 0x65b   :  { %v321_v6 = vpop.xlane.xlu0 %320 }
 0x65f   :  { %v566_v17 = vpop.permute.xlu0 %565 }
 0x6de   :  { %v538_v61 = vpop.f32.mrb[12].mxu1 }
 0x6df   :  { %v539_v62 = vadd.f32 %v538_v61, %v877_v13  ;;  %v711_v63 = vpop.f32.mrb[13].mxu1 }
 0x6e0   :  { %v541_v1 = vpop.f32.mrb[14].mxu1 }
 0x6e1   :  { %v545_v2 = vrot.slane %v539_v62, 1  ;;  %v548_v3 = vadd.f32 %v539_v62, %v425_v31  ;;  %v712_v4 = vpop.f32.mrb[15].mxu1 }
 0x6e3   :  { %v549_v5 = vadd.f32 %v545_v2, %v426_v34  ;;  %v550_v7 = vpack.c.bf16 %v548_v3, %v548_v3 }
 0x6e5   :  { %v551_v8 = vpack.c.bf16 %v549_v5, %v549_v5  ;;  %v554_v12 = vunpack.c.l.b16 %v550_v7 }
 0x6e7   :  { %v555_v9 = vunpack.c.l.b16 %v551_v8 }
 0x6e9   :  { %v556_v14 = vrot.slane %v555_v9, 7 }
 0x6eb   :  { %v557_v15 = vsel %vm315_vm4, %v556_v14, %v554_v12 }
 0x6ec   :  { %v558_v16 = vpack.c.b16 %v557_v15, %v557_v15 }
 0x6ee   :  { %718 = vmatmul.mubr.msk.bf16.vlgmr.msra.gmra.mrb[16].mxu0 %vm48_vm1, %v558_v16 }
 0x7c1   :  { %v605_v18 = vpop.f32.mrb[16].mxu0 }
 0x7c2   :  { %v606_v13 = vadd.f32 %v605_v18, %v566_v17  ;;  %v719_v19 = vpop.f32.mrb[17].mxu0 }
 0x7c3   :  { %v608_v20 = vpop.f32.mrb[18].mxu0 }
 0x7c4   :  { %v612_v21 = vsel %vm611_vm6, %v606_v13, %v321_v6  ;;  %v720_v22 = vpop.f32.mrb[19].mxu0 }
 0x7c5   :  { %614 = vst.msk [vmem:[%s903_s4] sm:$0x3] %vm613_vm7, %v612_v21 }

</bundles_post_ra>
